<compile_context>
chip_gen: v5e
topology: v5e:2x2
jax: 0.10.0
libtpu: 0.0.40
codegen_flags: <defaults>
</compile_context>

<pallas_src>
import jax
import jax.numpy as jnp
from jax.experimental import pallas as pl
from jax.experimental.pallas import tpu as pltpu


def _round_up(a: int, b: int) -> int:
    return (a + b - 1) // b * b


def _choose_tiles(C: int, HW: int, itemsize: int,
                  target_block_bytes: int = 2 * 1024 * 1024):
    """Pick (channel_tile, hw_tile, padded_HW) giving ~1-4 MiB contiguous input blocks."""
    hw128 = _round_up(HW, 128)
    if C * hw128 * itemsize <= 2 * target_block_bytes:
        # Whole (lane-padded) spatial extent fits comfortably -> single reduction step.
        thw = hw128
    else:
        thw = max(512, (target_block_bytes // (C * itemsize)) // 128 * 128)
        thw = min(thw, hw128)
    hw_pad = _round_up(HW, thw)

    tc = C
    if C % 8 == 0:
        # Keep channel tile a multiple of 8 and shrink until block <= target.
        while tc % 16 == 0 and tc * thw * itemsize > target_block_bytes:
            tc //= 2
    return tc, thw, hw_pad


def _masked_l1_partial_kernel(x_ref, m_ref, t_ref, out_ref):
    """Accumulate per-(n, c-block) lane-dense partial sums of |x*m - t| over HW tiles."""
    k = pl.program_id(2)  # reduction axis (HW tiles)

    @pl.when(k == 0)
    def _():
        out_ref[...] = jnp.zeros_like(out_ref)

    x = x_ref[0].astype(jnp.float32)        # (tc, thw)
    t = t_ref[0].astype(jnp.float32)        # (tc, thw)
    m = m_ref[0].astype(jnp.float32)        # (1, thw) or (tc, thw): broadcasts in-register
    d = jnp.abs(x * m - t)                  # (tc, thw)   pure VPU work
    partial = jnp.sum(d, axis=0, keepdims=True)     # (1, thw): sublane reduce only
    out_ref[...] += partial[None, None]             # lane-dense resident accumulator


def identity_loss_forward(x, mask, target, weight):
    """Returns (input_unchanged, scalar_loss).

    x, target: (N, C, H, W); mask: (N, 1, H, W) or (N, C, H, W); weight: python float.
    """
    N, C, H, W = x.shape
    HW = H * W
    numel = N * C * HW
    itemsize = jnp.dtype(x.dtype).itemsize

    tc, thw, hw_pad = _choose_tiles(C, HW, itemsize)

    x3 = x.reshape(N, C, HW)
    t3 = target.reshape(N, C, HW)
    Cm = mask.shape[1]
    assert Cm in (1, C), "mask must be (N,1,H,W) or (N,C,H,W)"
    m3 = mask.reshape(N, Cm, HW)

    if hw_pad != HW:
        pad = hw_pad - HW
        # Zero padding is sum-neutral for |x*m - t| (x=t=0 => contribution 0).
        x3 = jnp.pad(x3, ((0, 0), (0, 0), (0, pad)))
        t3 = jnp.pad(t3, ((0, 0), (0, 0), (0, pad)))
        m3 = jnp.pad(m3, ((0, 0), (0, 0), (0, pad)))

    n_cblk = C // tc
    n_hwblk = hw_pad // thw
    grid = (N, n_cblk, n_hwblk)

    if Cm == 1:
        # Broadcast mask: its index_map ignores the channel grid axis (never materialized).
        mask_spec = pl.BlockSpec((1, 1, thw), lambda n, c, k: (n, 0, k))
    else:
        mask_spec = pl.BlockSpec((1, tc, thw), lambda n, c, k: (n, c, k))

    bytes_accessed = int(
        x3.size * x3.dtype.itemsize
        + t3.size * t3.dtype.itemsize
        + m3.size * m3.dtype.itemsize
        + N * n_cblk * thw * 4
    )
    cost = pl.CostEstimate(flops=4 * numel, transcendentals=0,
                           bytes_accessed=bytes_accessed)

    partials = pl.pallas_call(
        _masked_l1_partial_kernel,
        out_shape=jax.ShapeDtypeStruct((N, n_cblk, 1, thw), jnp.float32),
        grid_spec=pltpu.PrefetchScalarGridSpec(
            num_scalar_prefetch=0,
            grid=grid,
            in_specs=[
                pl.BlockSpec((1, tc, thw), lambda n, c, k: (n, c, k)),  # x
                mask_spec,                                              # mask
                pl.BlockSpec((1, tc, thw), lambda n, c, k: (n, c, k)),  # target
            ],
            out_specs=pl.BlockSpec((1, 1, 1, thw), lambda n, c, k: (n, c, 0, 0)),
        ),
        compiler_params=pltpu.CompilerParams(
            dimension_semantics=("parallel", "parallel", "arbitrary"),
            vmem_limit_bytes=32 * 1024 * 1024,
        ),
        cost_estimate=cost,
    )(x3, m3, t3)

    # Tiny final cross-lane reduction + scaling in plain XLA.
    loss = jnp.sum(partials) * (float(weight) / float(numel))

    # Identity: forward returns the input unchanged; loss reported on the side.
    return x, loss


if __name__ == "__main__":
    key = jax.random.PRNGKey(0)
    kx, kt, km = jax.random.split(key, 3)

    N, C, H, W = 2, 4, 16, 16
    x = jax.random.normal(kx, (N, C, H, W), dtype=jnp.float32)
    target = jax.random.normal(kt, (N, C, H, W), dtype=jnp.float32)
    # Module stores a single-channel mask that is expanded over channels in forward().
    mask = (jax.random.uniform(km, (N, 1, H, W)) > 0.5).astype(jnp.float32)
    weight = 0.75

    out, loss = identity_loss_forward(x, mask, target, weight)
    out = jax.block_until_ready(out)
    loss = jax.block_until_ready(loss)

    # Reference: mean-reduction L1 of (x * expanded mask) vs target, times weight.
    ref_loss = jnp.mean(jnp.abs(x * jnp.broadcast_to(mask, x.shape) - target)) * weight
    assert jnp.allclose(loss, ref_loss, rtol=1e-5, atol=1e-6), (loss, ref_loss)
    assert jnp.array_equal(out, x)

    print("KERNEL_OK")
</pallas_src>

<mosaic_0001>
module attributes {stable_mosaic.version = 11 : i64} {
  func.func @_masked_l1_partial_kernel(%arg0: i32, %arg1: i32, %arg2: i32, %arg3: memref<1x4x256xf32, #tpu.memory_space<vmem>>, %arg4: memref<1x1x256xf32, #tpu.memory_space<vmem>>, %arg5: memref<1x4x256xf32, #tpu.memory_space<vmem>>, %arg6: memref<1x1x1x256xf32, #tpu.memory_space<vmem>>) attributes {dimension_semantics = [#tpu.dimension_semantics<parallel>, #tpu.dimension_semantics<parallel>, #tpu.dimension_semantics<arbitrary>], iteration_bounds = array<i64: 2, 1, 1>, scalar_prefetch = 0 : i64, scratch_operands = 0 : i64, tpu.core_type = #tpu.core_type<tc>, window_params = [{transform_indices = @transform_0, window_bounds = array<i64: 1, 4, 256>}, {transform_indices = @transform_1, window_bounds = array<i64: 1, 1, 256>}, {transform_indices = @transform_2, window_bounds = array<i64: 1, 4, 256>}, {transform_indices = @transform_3, window_bounds = array<i64: 1, 1, 1, 256>}]} {
    %c0_i32 = arith.constant 0 : i32
    %0 = arith.cmpi eq, %arg2, %c0_i32 : i32
    %1 = arith.extui %0 : i1 to i32
    %c0_i32_0 = arith.constant 0 : i32
    %2 = arith.cmpi ne, %1, %c0_i32_0 : i32
    scf.if %2 {
      %cst_17 = arith.constant 0.000000e+00 : f32
      %19 = vector.broadcast %cst_17 : f32 to vector<1x1x1x256xf32>
      %c0_18 = arith.constant 0 : index
      %c0_19 = arith.constant 0 : index
      %c0_20 = arith.constant 0 : index
      %c0_21 = arith.constant 0 : index
      %20 = vector.load %arg6[%c0_18, %c0_19, %c0_20, %c0_21] : memref<1x1x1x256xf32, #tpu.memory_space<vmem>>, vector<1x1x1x256xf32>
      tpu.vector_store %arg6[%c0_18, %c0_19, %c0_20, %c0_21], %19 {strides = array<i32>} : memref<1x1x1x256xf32, #tpu.memory_space<vmem>>, vector<1x1x1x256xf32>,
    } else {
    }
    %c0 = arith.constant 0 : index
    %c0_1 = arith.constant 0 : index
    %c0_2 = arith.constant 0 : index
    %3 = vector.load %arg3[%c0, %c0_1, %c0_2] : memref<1x4x256xf32, #tpu.memory_space<vmem>>, vector<1x4x256xf32>
    %4 = vector.shape_cast %3 : vector<1x4x256xf32> to vector<4x256xf32>
    %c0_3 = arith.constant 0 : index
    %c0_4 = arith.constant 0 : index
    %c0_5 = arith.constant 0 : index
    %5 = vector.load %arg5[%c0_3, %c0_4, %c0_5] : memref<1x4x256xf32, #tpu.memory_space<vmem>>, vector<1x4x256xf32>
    %6 = vector.shape_cast %5 : vector<1x4x256xf32> to vector<4x256xf32>
    %c0_6 = arith.constant 0 : index
    %c0_7 = arith.constant 0 : index
    %c0_8 = arith.constant 0 : index
    %7 = vector.load %arg4[%c0_6, %c0_7, %c0_8] : memref<1x1x256xf32, #tpu.memory_space<vmem>>, vector<1x1x256xf32>
    %8 = vector.shape_cast %7 : vector<1x1x256xf32> to vector<1x256xf32>
    %9 = vector.broadcast %8 : vector<1x256xf32> to vector<4x256xf32>
    %10 = arith.mulf %4, %9 : vector<4x256xf32>
    %11 = arith.subf %10, %6 : vector<4x256xf32>
    %12 = math.absf %11 : vector<4x256xf32>
    %cst = arith.constant dense<0.000000e+00> : vector<256xf32>
    %13 = vector.multi_reduction <add>, %12, %cst [0] : vector<4x256xf32> to vector<256xf32>
    %14 = vector.shape_cast %13 : vector<256xf32> to vector<1x256xf32>
    %c0_9 = arith.constant 0 : index
    %c0_10 = arith.constant 0 : index
    %c0_11 = arith.constant 0 : index
    %c0_12 = arith.constant 0 : index
    %15 = vector.load %arg6[%c0_9, %c0_10, %c0_11, %c0_12] : memref<1x1x1x256xf32, #tpu.memory_space<vmem>>, vector<1x1x1x256xf32>
    %16 = vector.shape_cast %14 : vector<1x256xf32> to vector<1x1x1x256xf32>
    %17 = arith.addf %15, %16 : vector<1x1x1x256xf32>
    %c0_13 = arith.constant 0 : index
    %c0_14 = arith.constant 0 : index
    %c0_15 = arith.constant 0 : index
    %c0_16 = arith.constant 0 : index
    %18 = vector.load %arg6[%c0_13, %c0_14, %c0_15, %c0_16] : memref<1x1x1x256xf32, #tpu.memory_space<vmem>>, vector<1x1x1x256xf32>
    tpu.vector_store %arg6[%c0_13, %c0_14, %c0_15, %c0_16], %17 {strides = array<i32>} : memref<1x1x1x256xf32, #tpu.memory_space<vmem>>, vector<1x1x1x256xf32>,
    return
  }
  func.func @transform_0(%arg0: i32, %arg1: i32, %arg2: i32) -> (i32, i32, i32) {
    %c0_i32 = arith.constant 0 : i32
    return %arg0, %arg1, %arg2 : i32, i32, i32
  }
  func.func @transform_1(%arg0: i32, %arg1: i32, %arg2: i32) -> (i32, i32, i32) {
    %c0_i32 = arith.constant 0 : i32
    %c0_i32_0 = arith.constant 0 : i32
    return %arg0, %c0_i32, %arg2 : i32, i32, i32
  }
  func.func @transform_2(%arg0: i32, %arg1: i32, %arg2: i32) -> (i32, i32, i32) {
    %c0_i32 = arith.constant 0 : i32
    return %arg0, %arg1, %arg2 : i32, i32, i32
  }
  func.func @transform_3(%arg0: i32, %arg1: i32, %arg2: i32) -> (i32, i32, i32, i32) {
    %c0_i32 = arith.constant 0 : i32
    %c0_i32_0 = arith.constant 0 : i32
    %c0_i32_1 = arith.constant 0 : i32
    return %arg0, %arg1, %c0_i32, %c0_i32_0 : i32, i32, i32, i32
  }
}

</mosaic_0001>

<bundles_post_ra>
// kernel: tpu_custom_call.1
= control target key start
LH: loop header
LB: loop body
LE: loop exit
PB: predicated region body
PF: predicated region fallthrough
CT: control target
= control target key end

     0   :  { %s983_s0 = inlined_call_operand.hbm [shape: f32[2,4,256], index: 0, kind: input, shape index: {}]   ;;  %s984_s1 = inlined_call_operand.hbm [shape: f32[2,1,256], index: 1, kind: input, shape index: {}]   ;;  %s985_s2 = inlined_call_operand.hbm [shape: f32[2,4,256], index: 2, kind: input, shape index: {}]   ;;  %s986_s3 = inlined_call_operand.hbm [shape: f32[2,1,1,256], index: 3, kind: output, shape index: {}]  }
   0x1   :  { %989 = sst [smem:[#allocation15_spill]] %s984_s1 }
   0x2   :  { %8 = vsyncpa [#allocation3], 0 }
   0x3   :  { %10 = vsyncpa [#allocation3 + $0x1], 0 }
   0x4   :  { %11 = vsyncpa [#allocation6], 0 }
   0x5   :  { %13 = vsyncpa [#allocation6 + $0x1], 0 }
   0x6   :  { %14 = vsyncpa [#allocation4], 0 }
   0x7   :  { %16 = vsyncpa [#allocation4 + $0x1], 0  ;;  %s815_s12 = smov 0   ;;  %s817_s13 = smov 0  }
   0x8   :  { %s819_s14 = smov 0   ;;  %s821_s15 = smov 0  }
   0x9   :  { %s823_s16 = smov 0   ;;  %s825_s17 = smov 0  }
   0xa LB: > { %990 = sst [smem:[#allocation12_spill]] %s780_s14  ;;  %s846_s18 = sadd.s32 4294967295, %s792_s17   ;;  %s792_s17 = sphi %s825_s17, %s22_s17   ;;  %s788_s16 = sphi %s823_s16, %s1008_s16   ;;  %s784_s15 = sphi %s821_s15, %s1007_s15   ;;  %s780_s14 = sphi %s819_s14, %s1003_s14   ;;  %s776_s13 = sphi %s817_s13, %s1006_s13   ;;  %s772_s12 = sphi %s815_s12, %s1005_s12  }
   0xb   : > { %s521_s19 = sadd.s32 4294967294, %s792_s17   ;;  %s41_s20 = sadd.s32 1, %s788_s16 }
   0xc   : > { %s52_s21 = sadd.s32 1, %s780_s14  ;;  %p43_p0 = scmp.ge.s32.totalorder %s41_s20, 2 }
   0xd   : > { %p59_p1 = scmp.ne.s32.totalorder %s780_s14, %s776_s13  ;;  %p60_p2 = scmp.eq.s32.totalorder %s792_s17, 0 }
   0xe   : > { %p65_p3 = scmp.ne.s32.totalorder %s776_s13, %s772_s12  ;;  %s1010_s20 = smov (%p43_p0, %s41_s20), 0 }
   0xf   : > { %991 = sst [smem:[#allocation13_spill]] %s1010_s20  ;;  %p858_p4 = por %p60_p2, %p59_p1 }
  0x10   : > { %p66_p5 = scmp.eq.s32.totalorder %s846_s18, 0  ;;  %s45_s23 = ssub.s32 %s788_s16, %s1010_s20 }
  0x11   : > { %p149_p6 = scmp.eq.s32.totalorder %s846_s18, 1  ;;  %p50_p7 = scmp.eq.s32.totalorder %s45_s23, 0 }
  0x12   : > { %p866_p8 = por %p66_p5, %p65_p3  ;;  %p155_p10 = scmp.eq.s32.totalorder %s521_s19, 1 }
  0x13   : > { %p870_p9 = por %p149_p6, %p59_p1  ;;  %p523_p12 = scmp.ge.s32.totalorder %s792_s17, 2 }
  0x14   : > { %s875_s26 = scalar_select %p50_p7, %s780_s14, %s52_s21  }
  0x15   : > { %p877_p11 = por %p155_p10, %p65_p3  ;;  %p565_p13 = scmp.lt.s32.totalorder %s792_s17, 2 }
  0x16   : > { %995 = sst [smem:[#allocation14_spill]] %s875_s26  ;;  %s175_s28 = sand.u32 1, %s780_s14  }
  0x17   : > { %s199_s29 = sand.u32 1, %s792_s17   ;;  %s527_s30 = sshll.u32 %s175_s28, 1 }
  0x18   : > { %p887_p0 = pnand %p565_p13, %p858_p4  ;;  %s528_s5 = sshll.u32 %s788_s16, 1 }
  0x19   : > { %s998_s1 = sld [smem:[#allocation15_spill]]  ;;  %s203_s10 = scalar_lea.vmem [#allocation5], %s527_s30 }
  0x1a   : > { %s213_s11 = sshll.u32 %s203_s10, 4  ;;  %s200_s19 = scalar_lea.sflag [#allocation6], %s199_s29  ;;  %s214_s11 = int_to_ptr.vmem [resolvable:$true] %s213_s11 }
  0x1b   : > { %p532_p1 = scmp.ge.s32.totalorder %s792_s17, 1  ;;  %p242_p2 = scmp.lt.s32.totalorder %s792_s17, 3 }
  0x1c   : > { %s524_s22 = sshll.u32 %s175_s28, 3  ;;  %s541_s23 = sshll.u32 %s788_s16, 3 }
  0x1d   : > { %p899_p3 = pnand %p532_p1, %p242_p2  ;;  %s188_s30 = scalar_lea.hbm %s983_s0, %s541_s23 }
  0x1e   : > { %s190_s7 = sshll.u32 %s188_s30, 4  ;;  %s176_s29 = scalar_lea.sflag [#allocation3], %s175_s28  ;;  %s191_s7 = int_to_ptr.hbm [resolvable:$true] %s190_s7 }
  0x1f   : > { %s209_s8 = scalar_lea.hbm %s998_s1, %s528_s5  ;;  %s233_s1 = scalar_lea.hbm %s985_s2, %s541_s23 }
  0x20   : > { %s211_s9 = sshll.u32 %s209_s8, 4  ;;  %s179_s8 = scalar_lea.vmem [#allocation2], %s524_s22  ;;  %s212_s9 = int_to_ptr.hbm [resolvable:$true] %s211_s9 }
  0x21   : > { %557 = dma.hbm_to_vmem [thread:$0]  (!%p887_p0), %s212_s9, 32, %s214_s11, %s200_s19  }
  0x22   : > { %s192_s10 = sshll.u32 %s179_s8, 4  ;;  %s235_s20 = sshll.u32 %s233_s1, 4  ;;  %s193_s10 = int_to_ptr.vmem [resolvable:$true] %s192_s10  ;;  %s236_s20 = int_to_ptr.hbm [resolvable:$true] %s235_s20 }
  0x23   : > { %554 = dma.hbm_to_vmem [thread:$0]  (!%p887_p0), %s191_s7, 128, %s193_s10, %s176_s29  }
  0x24   : > { %s224_s26 = scalar_lea.vmem [#allocation7], %s524_s22  ;;  %246 = sbr.rel (%p899_p3) target bundleno = 86 (0x56), region = 32 }
  0x25   : > { %s237_s14 = sshll.u32 %s224_s26, 4  ;;  %s917_s6 = sand.u32 (!%p899_p3), 1, %s776_s13   ;;  %s238_s14 = int_to_ptr.vmem [resolvable:$true] %s237_s14 }
  0x26   : > { %560 = dma.hbm_to_vmem [thread:$0]  (!%p887_p0), %s236_s20, 128, %s238_s14, %s200_s19  }
  0x27   : > { %s533_s28 = sshll.u32 (!%p899_p3), %s917_s6, 3  ;;  %s249_s5 = scalar_lea.sflag (!%p899_p3), [#allocation3], %s917_s6 }
  0x28   : > { %s252_s30 = scalar_lea.vmem (!%p899_p3), [#allocation2], %s533_s28 }
  0x29   : > { %759 = dma.done.wait (%p866_p8), %s249_s5, 128  }
  0x2a   : > { %761 = vsyncadd (%p866_p8), %s249_s5, 4294967168  ;;  %s258_s1 = sand.u32 1, %s846_s18   ;;  %s534_s14 = sshll.u32 %s917_s6, 1 }
  0x2b   : > { %s259_s20 = scalar_lea.sflag [#allocation6], %s258_s1  ;;  %s262_s26 = scalar_lea.vmem [#allocation5], %s534_s14 }
  0x2c   : > { %763 = dma.done.wait (%p866_p8), %s259_s20, 160  }
  0x2d   : > { %765 = vsyncadd (%p866_p8), %s259_s20, 4294967136  ;;  %v313_v0 = vlaneseq  ;;  %s935_s4 = scalar_lea.vmem [#allocation8], %s534_s14  ;;  %v794_v2 = vmov 0.0   ;;  %v320_v3 = vld [vmem:[%s262_s26] sm:$0x3]  ;;  %vm325_vm1 = vcmask 1043456  }
  0x2e   : > { %v322_v4 = vperm.slane %v320_v3, 0  ;;  %v323_v5 = vperm.slane %v320_v3, 1  ;;  %v318_v6 = vld [vmem:[%s252_s30] sm:$0xff]  ;;  %s272_s18 = scalar_lea.vmem [#allocation7], %s533_s28  ;;  %s538_s24 = sshll.u32 %s784_s15, 1  ;;  %vm355_vm2 = vcmask 1040384  }
  0x2f   : > { %vm931_vm0 = vcmp.lt.s32.totalorder %v313_v0, 256  ;;  %v319_v8 = vld [vmem:[%s272_s18] sm:$0xff]  ;;  %s377_s22 = scalar_lea.hbm %s986_s3, %s538_s24  ;;  %s379_s23 = sshll.u32 %s935_s4, 4  ;;  %s380_s23 = int_to_ptr.vmem [resolvable:$true] %s379_s23 }
  0x30   : > { %317 = vst.msk [vmem:[%s935_s4] sm:$0x3] %vm931_vm0, %v794_v2  ;;  %v324_v7 = vrot.slane %v323_v5, 4  ;;  %s381_s7 = sshll.u32 %s377_s22, 4  ;;  %s365_s15 = scalar_lea.sflag [#allocation4], %s917_s6  ;;  %s382_s7 = int_to_ptr.hbm [resolvable:$true] %s381_s7 }
  0x31   : > { %s720_s8 = sshra.s32 %s382_s7, 4  ;;  %s726_s11 = scalar_lea.hbm %s986_s3, 4  ;;  %s721_s8 = int_to_ptr.hbm [resolvable:$true] %s720_s8 }
  0x32   : > { %v326_v9 = vsel %vm325_vm1, %v322_v4, %v324_v7  ;;  %s722_s10 = scalar_lea.hbm %s721_s8, 2  ;;  %p727_p7 = scmp.lt.s32.totalorder %s721_s8, %s986_s3 }
  0x33   : > { %v328_v10 = vmul.f32 %v326_v9, %v318_v6  ;;  %p723_p4 = scmp.ne.s32.totalorder %s721_s8, %s722_s10  ;;  %p728_p8 = scmp.lt.s32.totalorder %s726_s11, %s722_s10 }
  0x35   : > { %v329_v11 = vsub.f32 %v328_v10, %v319_v8  ;;  %p724_p5 = pnand %p723_p4, %p870_p9  ;;  %p729_p10 = por %p728_p8, %p727_p7 }
  0x37   : > { %v330_v12 = vand.u32 2147483647, %v329_v11  ;;  %v351_v29 = vld [vmem:[%s935_s4] sm:$0x3]  ;;  %p725_p6 = pneg %p724_p5 }
  0x39   : > { %332 = vst [vmem:[#allocation1] ss:$2 sm:$0xff] %v330_v12  ;;  %p730_p13 = pnand %p729_p10, %p725_p6 }
  0x40   : > { %v333_v13 = vld.sshfl [vmem:[#allocation1] sm:$0xff pattern:$0x75316420]  ;;  %v334_v14 = vld.sshfl [vmem:[#allocation1 + $0x8] sm:$0xff pattern:$0x75316420] }
  0x41   : > { %v337_v15 = vsel %vm325_vm1, %v333_v13, 0.0  ;;  %v344_v16 = vsel %vm325_vm1, %v334_v14, 0.0 }
  0x42   : > { %v338_v17 = vrot.slane %v337_v15, 4  ;;  %v345_v18 = vrot.slane %v344_v16, 4 }
  0x44   : > { %v339_v19 = vadd.f32 %v338_v17, %v337_v15  ;;  %v346_v20 = vadd.f32 %v345_v18, %v344_v16 }
  0x46   : > { %v340_v21 = vrot.slane %v339_v19, 2  ;;  %v347_v22 = vrot.slane %v346_v20, 2 }
  0x48   : > { %v341_v23 = vadd.f32 %v340_v21, %v339_v19  ;;  %v348_v24 = vadd.f32 %v347_v22, %v346_v20 }
  0x4a   : > { %v342_v25 = vrot.slane %v341_v23, 1  ;;  %v349_v26 = vrot.slane %v348_v24, 1 }
  0x4c   : > { %v350_v27 = vadd.f32 %v349_v26, %v348_v24  ;;  %v343_v28 = vadd.f32 %v342_v25, %v341_v23 }
  0x4e   : > { %v354_v30 = vrot.slane %v350_v27, 7 }
  0x50   : > { %v356_v31 = vsel %vm355_vm2, %v343_v28, %v354_v30 }
  0x51   : > { %v358_v32 = vadd.f32 %v356_v31, %v351_v29 }
  0x53   : > { %363 = vst.msk [vmem:[%s935_s4] sm:$0x3] %vm931_vm0, %v358_v32 }
  0x54   : > { %733 = shalt.err (!%p730_p13)
}
  0x55   : > { %549 = dma.vmem_to_hbm [thread:$0]  (%p870_p9), %s380_s23, 32, %s382_s7, %s365_s15  }
  0x56 PF: > { %s393_s6 = sand.u32 1, %s772_s12   ;;  %p562_p0 = pnand %p523_p12, %p877_p11 }
  0x57   : > { %s394_s30 = scalar_lea.sflag [#allocation4], %s393_s6 }
  0x58   : > { %p563_p1 = pneg %p562_p0 }
  0x5a   : > { %767 = dma.done.wait (%p563_p1), %s394_s30, 32  }
  0x5b   : > { %769 = vsyncadd (%p563_p1), %s394_s30, 4294967264  ;;  %s22_s17 = sadd.s32 1, %s792_s17   ;;  %s1002_s1 = sld [smem:[#allocation12_spill]] }
  0x5c   : > { %p19_p2 = scmp.ge.s32.totalorder %s22_s17, 4   ;;  %s1003_s14 = sld [smem:[#allocation14_spill]] }
  0x5d   : > { %s1004_s25 = sld [smem:[#allocation13_spill]]  ;;  %s1005_s12 = smov %s776_s13 }
  0x5e   : > { %s1007_s15 = smov %s788_s16 }
  0x5f   :  { %21 = sbr.rel (!%p19_p2) target bundleno = 10 (0xa), region = 105 }
  0x61   : > { %s1006_s13 = smov %s1002_s1 }
  0x63   : > { %s1008_s16 = smov %s1004_s25 }
  0x64   :  { %400 = vsyncpa [#allocation3], 1 }
  0x65   :  { %402 = vsyncpa [#allocation3 + $0x1], 1 }
  0x66   :  { %403 = vsyncpa [#allocation6], 1 }
  0x67   :  { %405 = vsyncpa [#allocation6 + $0x1], 1 }
  0x68   :  { %406 = vsyncpa [#allocation4], 1 }
  0x69   :  { %408 = vsyncpa [#allocation4 + $0x1], 1 }

</bundles_post_ra>
